<compile_context>
chip_gen: v6e
topology: v6e:2x2x1
jax: 0.10.0
libtpu: 0.0.40
codegen_flags: <defaults>
</compile_context>

<pallas_src>
import jax
import jax.numpy as jnp
from jax.experimental import pallas as pl
from jax.experimental.pallas import tpu as pltpu


def _round_up(a: int, b: int) -> int:
    return ((a + b - 1) // b) * b


def made_layer_kernel(x_ref, w_ref, b_ref, o_ref):
    # x_ref: (tm, K)  w_ref: (K, tn)  b_ref: (1, tn)  o_ref: (tm, tn)
    # Mask fusion / transpose / padding were done once in the static prep, so
    # the body is a clean MXU matmul with f32 accumulation + f32 bias add.
    acc = jnp.dot(x_ref[...], w_ref[...], preferred_element_type=jnp.float32)
    o_ref[...] = (acc + b_ref[...].astype(jnp.float32)).astype(o_ref.dtype)


def prepare_made_params(weight, mask, bias, *, compute_dtype=jnp.float32,
                        n_align=128):
    """One-time static prep (do NOT call per forward).

    Fuses the MADE mask into the weight, pre-transposes to (K, N) for a clean
    (tm, K) x (K, N) MXU matmul, and zero-pads N to a lane multiple so output
    stores are lane-dense.  Bias stays f32 (added to the f32 accumulator)
    regardless of compute_dtype.
    """
    output_l, input_l = weight.shape
    n_out_pad = _round_up(output_l, n_align)
    w_t = (mask * weight).T.astype(compute_dtype)            # (K, N)
    w_p = jnp.zeros((input_l, n_out_pad), dtype=compute_dtype)
    w_p = w_p.at[:, :output_l].set(w_t)
    b_p = jnp.zeros((1, n_out_pad), dtype=jnp.float32)
    b_p = b_p.at[0, :output_l].set(bias.astype(jnp.float32))
    return {"w": w_p, "b": b_p, "input_l": input_l, "output_l": output_l}


def made_layer_apply(params, x, *, tm=512, tn=512, out_dtype=jnp.float32):
    """x: (..., input_l) -> (N, output_l), matching MadeLayer.forward."""
    w_p, b_p = params["w"], params["b"]
    input_l, output_l = params["input_l"], params["output_l"]
    n_out_pad = w_p.shape[1]

    x2 = x.reshape(-1, input_l)
    n = x2.shape[0]
    if n == 0:                                   # empty-batch guard
        return jnp.zeros((0, output_l), dtype=out_dtype)
    x2 = x2.astype(w_p.dtype)                    # no-op for f32; bf16 halves traffic

    dtype_bytes = jnp.dtype(w_p.dtype).itemsize
    sublane = (8 * 4) // dtype_bytes             # 8 for f32, 16 for bf16
    tm_eff = _round_up(min(tm, _round_up(n, sublane)), sublane)
    tn_eff = n_out_pad if n_out_pad <= tn else tn   # resident weight when small
    grid = (pl.cdiv(n, tm_eff), pl.cdiv(n_out_pad, tn_eff))

    # VMEM budget: double-buffered x / out tiles + weight / bias tiles (+2x slack).
    est = (2 * tm_eff * input_l * dtype_bytes
           + 2 * input_l * tn_eff * dtype_bytes
           + 2 * tn_eff * 4
           + 2 * tm_eff * tn_eff * 4)
    vmem_limit = int(min(64 << 20, max(32 << 20, 2 * est)))

    out_p = pl.pallas_call(
        made_layer_kernel,
        out_shape=jax.ShapeDtypeStruct((n, n_out_pad), out_dtype),
        grid_spec=pltpu.PrefetchScalarGridSpec(
            num_scalar_prefetch=0,
            grid=grid,
            in_specs=[
                pl.BlockSpec((tm_eff, input_l), lambda i, j: (i, 0)),  # x rows
                pl.BlockSpec((input_l, tn_eff), lambda i, j: (0, j)),  # fused W
                pl.BlockSpec((1, tn_eff), lambda i, j: (0, j)),        # bias
            ],
            out_specs=pl.BlockSpec((tm_eff, tn_eff), lambda i, j: (i, j)),
        ),
        compiler_params=pltpu.CompilerParams(
            dimension_semantics=("parallel", "parallel"),
            vmem_limit_bytes=vmem_limit,
        ),
    )(x2, w_p, b_p)

    # Drop lane padding (rows were never padded).
    return out_p[:, :output_l] if n_out_pad != output_l else out_p


if __name__ == "__main__":
    input_l, output_l = 32, 64
    batch, seq = 2, 8                            # x.view(-1, 32) -> 16 rows

    key = jax.random.PRNGKey(0)
    kx, kw, kb, km = jax.random.split(key, 4)

    x = jax.random.normal(kx, (batch, seq, input_l), dtype=jnp.float32)
    weight = jax.random.normal(kw, (output_l, input_l), dtype=jnp.float32)
    bias = jax.random.normal(kb, (output_l,), dtype=jnp.float32)
    # Autoregressive-style binary mask (stand-in for set_mask), (output_l, input_l).
    mask = (jax.random.uniform(km, (output_l, input_l)) > 0.5).astype(jnp.float32)

    ref = x.reshape(-1, input_l) @ (mask * weight).T + bias

    # f32 compute path (exact).
    params_f32 = prepare_made_params(weight, mask, bias,
                                     compute_dtype=jnp.float32)
    out = jax.block_until_ready(made_layer_apply(params_f32, x))
    assert out.shape == (batch * seq, output_l)
    assert jnp.allclose(out, ref, atol=1e-4, rtol=1e-4)

    # bf16 compute path (v6e/v7x MXU rate; f32 accumulation + f32 bias).
    params_bf16 = prepare_made_params(weight, mask, bias,
                                      compute_dtype=jnp.bfloat16)
    out_bf16 = jax.block_until_ready(made_layer_apply(params_bf16, x))
    assert out_bf16.shape == (batch * seq, output_l)
    assert jnp.allclose(out_bf16, ref, atol=2e-1, rtol=2e-2)

    # Ragged row count (exercises the masked boundary block, no x padding).
    x_odd = x.reshape(-1, input_l)[:11]
    out_odd = jax.block_until_ready(made_layer_apply(params_f32, x_odd))
    assert out_odd.shape == (11, output_l)
    assert jnp.allclose(out_odd, ref[:11], atol=1e-4, rtol=1e-4)

    print("KERNEL_OK")
</pallas_src>

<mosaic_0001>
module attributes {stable_mosaic.version = 11 : i64} {
  func.func @made_layer_kernel(%arg0: i32, %arg1: i32, %arg2: memref<16x32xf32, #tpu.memory_space<vmem>>, %arg3: memref<32x128xf32, #tpu.memory_space<vmem>>, %arg4: memref<1x128xf32, #tpu.memory_space<vmem>>, %arg5: memref<16x128xf32, #tpu.memory_space<vmem>>) attributes {dimension_semantics = [#tpu.dimension_semantics<parallel>, #tpu.dimension_semantics<parallel>], iteration_bounds = array<i64: 1, 1>, scalar_prefetch = 0 : i64, scratch_operands = 0 : i64, tpu.core_type = #tpu.core_type<tc>, window_params = [{transform_indices = @transform_0, window_bounds = array<i64: 16, 32>}, {transform_indices = @transform_1, window_bounds = array<i64: 32, 128>}, {transform_indices = @transform_2, window_bounds = array<i64: 1, 128>}, {transform_indices = @transform_3, window_bounds = array<i64: 16, 128>}]} {
    %c0 = arith.constant 0 : index
    %c0_0 = arith.constant 0 : index
    %0 = vector.load %arg2[%c0, %c0_0] : memref<16x32xf32, #tpu.memory_space<vmem>>, vector<16x32xf32>
    %c0_1 = arith.constant 0 : index
    %c0_2 = arith.constant 0 : index
    %1 = vector.load %arg3[%c0_1, %c0_2] : memref<32x128xf32, #tpu.memory_space<vmem>>, vector<32x128xf32>
    %cst = arith.constant dense<0.000000e+00> : vector<16x128xf32>
    %2 = tpu.matmul %0, %1, %cst {dimension_numbers = #tpu.dot_dimension_numbers<[1], [0], [0], [1], [0, 0, 1, 1], [], []>} : vector<16x32xf32>, vector<32x128xf32>, vector<16x128xf32> -> vector<16x128xf32>
    %c0_3 = arith.constant 0 : index
    %c0_4 = arith.constant 0 : index
    %3 = vector.load %arg4[%c0_3, %c0_4] : memref<1x128xf32, #tpu.memory_space<vmem>>, vector<1x128xf32>
    %4 = vector.broadcast %3 : vector<1x128xf32> to vector<16x128xf32>
    %5 = arith.addf %2, %4 : vector<16x128xf32>
    %c0_5 = arith.constant 0 : index
    %c0_6 = arith.constant 0 : index
    %6 = vector.load %arg5[%c0_5, %c0_6] : memref<16x128xf32, #tpu.memory_space<vmem>>, vector<16x128xf32>
    tpu.vector_store %arg5[%c0_5, %c0_6], %5 {strides = array<i32>} : memref<16x128xf32, #tpu.memory_space<vmem>>, vector<16x128xf32>,
    return
  }
  func.func @transform_0(%arg0: i32, %arg1: i32) -> (i32, i32) {
    %c0_i32 = arith.constant 0 : i32
    %c0_i32_0 = arith.constant 0 : i32
    return %arg0, %c0_i32 : i32, i32
  }
  func.func @transform_1(%arg0: i32, %arg1: i32) -> (i32, i32) {
    %c0_i32 = arith.constant 0 : i32
    %c0_i32_0 = arith.constant 0 : i32
    return %c0_i32, %arg1 : i32, i32
  }
  func.func @transform_2(%arg0: i32, %arg1: i32) -> (i32, i32) {
    %c0_i32 = arith.constant 0 : i32
    %c0_i32_0 = arith.constant 0 : i32
    return %c0_i32, %arg1 : i32, i32
  }
  func.func @transform_3(%arg0: i32, %arg1: i32) -> (i32, i32) {
    %c0_i32 = arith.constant 0 : i32
    return %arg0, %arg1 : i32, i32
  }
}

</mosaic_0001>

<bundles_post_ra>
// kernel: tpu_custom_call.1
= control target key start
LH: loop header
LB: loop body
LE: loop exit
PB: predicated region body
PF: predicated region fallthrough
CT: control target
= control target key end

     0   :  { %8 = vsyncpa [#allocation3], 0  ;;  %s297_s0 = inlined_call_operand.hbm [shape: f32[16,32], index: 0, kind: input, shape index: {}]   ;;  %s298_s1 = inlined_call_operand.hbm [shape: f32[32,128], index: 1, kind: input, shape index: {}]   ;;  %s299_s2 = inlined_call_operand.vmem [shape: f32[1,128], index: 2, kind: input, shape index: {}]   ;;  %s300_s3 = inlined_call_operand.hbm [shape: f32[16,128], index: 3, kind: output, shape index: {}]  }
   0x1   :  { %9 = vsyncpa [#allocation6], 0 }
   0x2   :  { %10 = vsyncpa [#allocation4], 0  ;;  %s249_s12 = smov [#allocation2]  }
   0x3   :  { %s16_s13 = sshll.u32 %s249_s12, 4  ;;  %s17_s13 = int_to_ptr.vmem [resolvable:$true] %s16_s13 }
   0x4   :  { %s191_s14 = scalar_lea.vmem %s17_s13, 256  ;;  %p196_p1 = scmp.lt.s32.totalorder %s17_s13, %s17_s13 }
   0x5   :  { %p192_p0 = scmp.ne.s32.totalorder %s17_s13, %s191_s14  ;;  %p197_p2 = scmp.lt.s32.totalorder %s191_s14, %s191_s14 }
   0x7   :  { %p198_p3 = por %p197_p2, %p196_p1 }
   0x9   :  { %p199_p4 = pnand %p198_p3, %p192_p0 }
   0xb   :  { %202 = shalt.err (!%p199_p4)
}
   0xc   :  { %s250_s15 = smov 128   ;;  %s251_s16 = smov 8  }
   0xd   :  { %22 = dma.hbm_to_vmem [thread:$0]  %s297_s0, 256, %s17_s13, [#allocation3], %s250_s15, %s250_s15, %s251_s16  }
   0xe   :  { %s252_s19 = smov [#allocation5]  }
   0xf   :  { %s28_s20 = sshll.u32 %s252_s19, 4  ;;  %s29_s20 = int_to_ptr.vmem [resolvable:$true] %s28_s20 }
  0x10   :  { %s211_s21 = scalar_lea.vmem %s29_s20, 512  ;;  %p216_p6 = scmp.lt.s32.totalorder %s29_s20, %s29_s20 }
  0x11   :  { %p212_p5 = scmp.ne.s32.totalorder %s29_s20, %s211_s21  ;;  %p217_p7 = scmp.lt.s32.totalorder %s211_s21, %s211_s21 }
  0x13   :  { %p218_p8 = por %p217_p7, %p216_p6 }
  0x15   :  { %p219_p9 = pnand %p218_p8, %p212_p5 }
  0x17   :  { %222 = shalt.err (!%p219_p9)
}
  0x18   :  { %34 = dma.hbm_to_vmem [thread:$0]  %s298_s1, 512, %s29_s20, [#allocation6], %s250_s15, %s250_s15, %s251_s16  }
  0x19   :  { %243 = dma.done.wait [#allocation3], 256  }
  0x1a   :  { %244 = vsyncadd [#allocation3], 4294967040 }
  0x1b   :  { %245 = dma.done.wait [#allocation6], 512  }
  0x1c   :  { %246 = vsyncadd [#allocation6], 4294966784  ;;  %vm56_vm0 = vcmask 261120   ;;  %v48_v0 = vld [vmem:[#allocation5 + $0x18] sm:$0xff]  ;;  %v47_v1 = vld [vmem:[#allocation5 + $0x10] sm:$0xff]  ;;  %s253_s24 = smov [#allocation7]  }
  0x1d   :  { %167 = vmatprep.subr.mxu0 %v48_v0  ;;  %v43_v2 = vld [vmem:[#allocation2] sm:$0xff]  ;;  %v46_v3 = vld [vmem:[#allocation5 + $0x8] sm:$0xff]  ;;  %v45_v4 = vld [vmem:[#allocation5] sm:$0xff]  ;;  %s145_s25 = sshll.u32 %s253_s24, 4  ;;  %s146_s25 = int_to_ptr.vmem [resolvable:$true] %s145_s25 }
  0x1e   :  { %168 = vmatpush3.msra.mxu0 %v48_v0  ;;  %175 = vmatprep.mubr.msk.f32.mxu0 %vm56_vm0, %v43_v2  ;;  %v44_v5 = vld [vmem:[#allocation2 + $0x8] sm:$0xff]  ;;  %v158_v6 = vld [vmem:[%s299_s2] ss:$0 sm:$0xff]  ;;  %s223_s26 = scalar_lea.vmem %s146_s25, 256  ;;  %p228_p11 = scmp.lt.s32.totalorder %s146_s25, %s146_s25 }
  0x1f   :  { %169 = vmatprep.subr.mxu0 %v47_v1  ;;  %p224_p10 = scmp.ne.s32.totalorder %s146_s25, %s223_s26  ;;  %p229_p12 = scmp.lt.s32.totalorder %s223_s26, %s223_s26 }
  0x20   :  { %170 = vmatpush3.msra.mxu0 %v47_v1 }
  0x21   :  { %171 = vmatprep.subr.mxu0 %v46_v3  ;;  %p230_p13 = por %p229_p12, %p228_p11 }
  0x22   :  { %172 = vmatpush3.msra.mxu0 %v46_v3 }
  0x23   :  { %173 = vmatprep.subr.mxu0 %v45_v4  ;;  %p231_p0 = pnand %p230_p13, %p224_p10 }
  0x24   :  { %174 = vmatpush3.msra.mxu0 %v45_v4 }
  0x25   :  { %176 = vmatmul.mubr.msk.f32.vlgmr.msra.gmra.mxu0 %vm56_vm0, %v44_v5 }
  0xe5   :  { %v177_v7 = vpop.f32.mrf.mxu0 }
  0xe6   :  { %v135_v8 = vadd.f32 %v177_v7, %v158_v6 }
  0xe7   :  { %v129_v9 = vpop.f32.mrf.mxu0 }
  0xe8   :  { %139 = vst [vmem:[#allocation7 + $0x8] sm:$0xff] %v135_v8  ;;  %v130_v10 = vadd.f32 %v158_v6, %v129_v9 }
  0xea   :  { %138 = vst [vmem:[#allocation7] sm:$0xff] %v130_v10 }
  0xeb   :  { %234 = shalt.err (!%p231_p0)
}
  0xec   :  { %151 = dma.vmem_to_hbm [thread:$0]  %s146_s25, 256, %s300_s3, [#allocation4], %s250_s15, %s250_s15, %s251_s16  }
  0xed   :  { %247 = dma.done.wait [#allocation4], 256  }
  0xee   :  { %248 = vsyncadd [#allocation4], 4294967040 }
  0xef   :  { %155 = vsyncpa [#allocation3], 1 }
  0xf0   :  { %156 = vsyncpa [#allocation6], 1 }
  0xf1   :  { %157 = vsyncpa [#allocation4], 1 }

</bundles_post_ra>
